<compile_context>
chip_gen: v7x
topology: tpu7x:2x2x1
jax: 0.10.0
libtpu: 0.0.40
codegen_flags: <defaults>
</compile_context>

<pallas_src>
import jax
import jax.numpy as jnp
from jax.experimental import pallas as pl
from jax.experimental.pallas import tpu as pltpu

IN_FEATURES = 10
HIGHEST = jax.lax.Precision.HIGHEST


def fused_mlp_kernel(xT_ref, w_ref, b_ref, o_ref):
    # xT_ref: [10, TILE_B]  (batch on the lane axis)
    # w_ref : [10, 1]       fused weight column  W1 @ W2
    # b_ref : [1, 1]        fused bias           b1 @ W2 + b2
    x = xT_ref[...].astype(jnp.float32)
    w = w_ref[...].astype(jnp.float32)
    prod = x * w                                               # VPU broadcast-mul -> [10, TILE_B]
    y = jnp.sum(prod, axis=0, keepdims=True)                   # XLU sublane reduce -> [1, TILE_B]
    y = y + b_ref[...].astype(jnp.float32)
    o_ref[...] = y.astype(o_ref.dtype)


def net_arch_forward(x, w1, b1, w2, b2, *, tile_b=1024):
    """Forward pass of Net_arch: fc2(fc1(x)).

    x  : [B, 10]   (same layout as the PyTorch module input)
    w1 : [10, 10]  fc1 weight, stored as (in_features, out_features)
    b1 : [1, 10]   fc1 bias
    w2 : [10, 1]   fc2 weight, stored as (in_features, out_features)
    b2 : [1, 1]    fc2 bias
    returns [B, 1]
    """
    B = x.shape[0]
    dtype = x.dtype

    # Fuse the two affine layers in f32 (no nonlinearity between them).
    w_eff = jnp.dot(w1.astype(jnp.float32), w2.astype(jnp.float32),
                    precision=HIGHEST).astype(dtype)                           # [10, 1]
    b_eff = (jnp.dot(b1.astype(jnp.float32), w2.astype(jnp.float32),
                     precision=HIGHEST) + b2.astype(jnp.float32)).astype(dtype)  # [1, 1]

    # Batch on the lane axis.  (If the caller can already supply x transposed,
    # this wrapper transpose disappears.)
    xT = x.T                                                                   # [10, B]

    if B <= tile_b:
        # Single block: full-extent dims are exempt from the (8,128) rule.
        tile_b = B
        Bp = B
        n_tiles = 1
    else:
        # Multi-block path: the lane dim of the BlockSpec must be a multiple of 128.
        tile_b = max(128, (tile_b // 128) * 128)
        pad = (-B) % tile_b
        if pad:
            xT = jnp.pad(xT, ((0, 0), (0, pad)))
        Bp = B + pad
        n_tiles = Bp // tile_b

    cost = pl.CostEstimate(
        flops=2 * Bp * IN_FEATURES,
        transcendentals=0,
        bytes_accessed=(IN_FEATURES * Bp + Bp + IN_FEATURES + 1) * x.dtype.itemsize,
    )

    yT = pl.pallas_call(
        fused_mlp_kernel,
        out_shape=jax.ShapeDtypeStruct((1, Bp), dtype),
        grid=(n_tiles,),
        in_specs=[
            pl.BlockSpec((IN_FEATURES, tile_b), lambda i: (0, i)),   # x tile (pipelined)
            pl.BlockSpec((IN_FEATURES, 1), lambda i: (0, 0)),        # fused weight (VMEM-resident)
            pl.BlockSpec((1, 1), lambda i: (0, 0)),                  # fused bias   (VMEM-resident)
        ],
        out_specs=pl.BlockSpec((1, tile_b), lambda i: (0, i)),       # lane-dense output
        compiler_params=pltpu.CompilerParams(
            dimension_semantics=("parallel",),                       # shards over 2 TCs on v7x
        ),
        cost_estimate=cost,
    )(xT, w_eff, b_eff)

    return yT[0, :B].reshape(B, 1)


def ref_forward(x, w1, b1, w2, b2):
    h = jnp.dot(x, w1, precision=HIGHEST) + b1
    return jnp.dot(h, w2, precision=HIGHEST) + b2


def init_params(key):
    """Deterministic init matching nn.Linear default (uniform +/- 1/sqrt(fan_in))."""
    k1, k2, k3, k4 = jax.random.split(key, 4)
    lim = 1.0 / jnp.sqrt(10.0)
    # Stored as (in_features, out_features) — i.e. PyTorch weight transposed.
    w1 = jax.random.uniform(k1, (10, 10), jnp.float32, -lim, lim)
    b1 = jax.random.uniform(k2, (1, 10), jnp.float32, -lim, lim)
    w2 = jax.random.uniform(k3, (10, 1), jnp.float32, -lim, lim)
    b2 = jax.random.uniform(k4, (1, 1), jnp.float32, -lim, lim)
    return w1, b1, w2, b2


if __name__ == "__main__":
    key = jax.random.PRNGKey(0)
    kx, kp = jax.random.split(key)
    w1, b1, w2, b2 = init_params(kp)

    # Small demo batch (single-block path).
    B0 = 8
    x0 = jax.random.normal(kx, (B0, IN_FEATURES), jnp.float32)
    out0 = jax.block_until_ready(net_arch_forward(x0, w1, b1, w2, b2))
    ref0 = ref_forward(x0, w1, b1, w2, b2)
    assert out0.shape == (B0, 1)
    assert jnp.allclose(out0, ref0, atol=1e-4, rtol=1e-4)

    # Non-multiple-of-128 batch exercising padding + the tiled, pipelined grid path.
    B1 = 320
    x1 = jax.random.normal(jax.random.fold_in(kx, 1), (B1, IN_FEATURES), jnp.float32)
    out1 = jax.block_until_ready(net_arch_forward(x1, w1, b1, w2, b2, tile_b=128))
    ref1 = ref_forward(x1, w1, b1, w2, b2)
    assert out1.shape == (B1, 1)
    assert jnp.allclose(out1, ref1, atol=1e-4, rtol=1e-4)

    print("KERNEL_OK")
</pallas_src>

<mosaic_0001>
module attributes {stable_mosaic.version = 11 : i64} {
  func.func @fused_mlp_kernel(%arg0: i32, %arg1: memref<10x8xf32, #tpu.memory_space<vmem>>, %arg2: memref<10x1xf32, #tpu.memory_space<vmem>>, %arg3: memref<1x1xf32, #tpu.memory_space<vmem>>, %arg4: memref<1x8xf32, #tpu.memory_space<vmem>>) attributes {dimension_semantics = [#tpu.dimension_semantics<parallel>], iteration_bounds = array<i64: 1>, scalar_prefetch = 0 : i64, scratch_operands = 0 : i64, tpu.core_type = #tpu.core_type<tc>, window_params = [{transform_indices = @transform_0, window_bounds = array<i64: 10, 8>}, {pipeline_mode = #tpu.pipeline_mode<synchronous>, transform_indices = @transform_1, window_bounds = array<i64: 10, 1>}, {pipeline_mode = #tpu.pipeline_mode<synchronous>, transform_indices = @transform_2, window_bounds = array<i64: 1, 1>}, {transform_indices = @transform_3, window_bounds = array<i64: 1, 8>}]} {
    %c0 = arith.constant 0 : index
    %c0_0 = arith.constant 0 : index
    %0 = vector.load %arg1[%c0, %c0_0] : memref<10x8xf32, #tpu.memory_space<vmem>>, vector<10x8xf32>
    %c0_1 = arith.constant 0 : index
    %c0_2 = arith.constant 0 : index
    %1 = vector.load %arg2[%c0_1, %c0_2] : memref<10x1xf32, #tpu.memory_space<vmem>>, vector<10x1xf32>
    %2 = vector.broadcast %1 : vector<10x1xf32> to vector<10x8xf32>
    %3 = arith.mulf %0, %2 : vector<10x8xf32>
    %cst = arith.constant dense<0.000000e+00> : vector<8xf32>
    %4 = vector.multi_reduction <add>, %3, %cst [0] : vector<10x8xf32> to vector<8xf32>
    %5 = vector.shape_cast %4 : vector<8xf32> to vector<1x8xf32>
    %c0_3 = arith.constant 0 : index
    %c0_4 = arith.constant 0 : index
    %6 = vector.load %arg3[%c0_3, %c0_4] : memref<1x1xf32, #tpu.memory_space<vmem>>, vector<1x1xf32>
    %7 = vector.broadcast %6 : vector<1x1xf32> to vector<1x8xf32>
    %8 = arith.addf %5, %7 : vector<1x8xf32>
    %c0_5 = arith.constant 0 : index
    %c0_6 = arith.constant 0 : index
    %9 = vector.load %arg4[%c0_5, %c0_6] : memref<1x8xf32, #tpu.memory_space<vmem>>, vector<1x8xf32>
    tpu.vector_store %arg4[%c0_5, %c0_6], %8 {strides = array<i32>} : memref<1x8xf32, #tpu.memory_space<vmem>>, vector<1x8xf32>,
    return
  }
  func.func @transform_0(%arg0: i32) -> (i32, i32) {
    %c0_i32 = arith.constant 0 : i32
    %c0_i32_0 = arith.constant 0 : i32
    return %c0_i32, %arg0 : i32, i32
  }
  func.func @transform_1(%arg0: i32) -> (i32, i32) {
    %c0_i32 = arith.constant 0 : i32
    %c0_i32_0 = arith.constant 0 : i32
    %c0_i32_1 = arith.constant 0 : i32
    return %c0_i32, %c0_i32_0 : i32, i32
  }
  func.func @transform_2(%arg0: i32) -> (i32, i32) {
    %c0_i32 = arith.constant 0 : i32
    %c0_i32_0 = arith.constant 0 : i32
    %c0_i32_1 = arith.constant 0 : i32
    return %c0_i32, %c0_i32_0 : i32, i32
  }
  func.func @transform_3(%arg0: i32) -> (i32, i32) {
    %c0_i32 = arith.constant 0 : i32
    %c0_i32_0 = arith.constant 0 : i32
    return %c0_i32, %arg0 : i32, i32
  }
}

</mosaic_0001>

<bundles_post_ra>
// kernel: tpu_custom_call.1
= control target key start
LH: loop header
LB: loop body
LE: loop exit
PB: predicated region body
PF: predicated region fallthrough
CT: control target
= control target key end

     0   :  { %s148_s0 = inlined_call_operand.vmem [shape: f32[10,8], index: 0, kind: input, shape index: {}]   ;;  %s149_s1 = inlined_call_operand.vmem [shape: f32[10,1], index: 1, kind: input, shape index: {}]   ;;  %s150_s2 = inlined_call_operand.<no memory space> [shape: f32[1,1], index: 2, kind: input, shape index: {}]   ;;  %s151_s3 = inlined_call_operand.hbm [shape: f32[1,8], index: 3, kind: output, shape index: {}]  }
   0x1   :  { %v8_v0 = vstv %s150_s2 }
   0x2   :  { %9 = vst [vmem:[#allocation2] sm:$0x1] %v8_v0 }
   0x3   :  { %v19_v1 = vld [vmem:[%s149_s1] sm:$0xff]  ;;  %v99_v3 = vmov 0  }
   0x4   :  { %73 = vset.pattern.permute.xlu0 %v99_v3  ;;  %74 = vset.pattern.permute.xlu1 %v99_v3 }
   0x9   :  { %v44_v2 = vld [vmem:[#allocation2] sm:$0x1] }
   0xa   :  { %10 = vsyncpa [#allocation4], 0  ;;  %23 = vperm.xlu0 %73, %v19_v1   ;;  %47 = vperm.xlu1 %74, %v44_v2   ;;  %v20_v4 = vld [vmem:[%s149_s1 + $0x8] sm:$0x3]  ;;  %v17_v6 = vld [vmem:[%s148_s0] sm:$0xff]  ;;  %vm33_vm0 = vcmask 64512   ;;  %v50_v11 = vlaneseq }
   0xb   :  { %v18_v7 = vld [vmem:[%s148_s0 + $0x8] sm:$0x3]  ;;  %vm35_vm1 = vcmask 58368   ;;  %s100_s1 = smov [#allocation3]   ;;  %vm55_vm2 = vcmask 57344  }
   0xc   :  { %v51_v16 = vshrl.u32 %v50_v11, 7  ;;  %s63_s0 = sshll.u32 %s100_s1, 4  ;;  %s64_s0 = int_to_ptr.vmem [resolvable:$true] %s63_s0 }
   0xd   :  { %s75_s21 = scalar_lea.vmem %s64_s0, 16  ;;  %s79_s22 = scalar_lea.vmem %s64_s0, 32 }
   0xe   :  { %28 = vperm.xlu0 %73, %v20_v4   ;;  %v52_v19 = vsub.s32 0, %v51_v16  ;;  %p76_p0 = scmp.ne.s32.totalorder %s64_s0, %s75_s21  ;;  %p80_p1 = scmp.lt.s32.totalorder %s64_s0, %s64_s0 }
   0xf   :  { %p81_p2 = scmp.lt.s32.totalorder %s79_s22, %s75_s21 }
  0x11   :  { %p82_p3 = por %p81_p2, %p80_p1 }
  0x13   :  { %p83_p4 = pnand %p82_p3, %p76_p0 }
  0x89   :  { %v24_v5 = vpop.permute.xlu0 %23  ;;  %v48_v20 = vpop.permute.xlu1 %47 }
  0x8a   :  { %v31_v8 = vmul.f32 %v24_v5, %v17_v6  ;;  %v53_v23 = vrot.slane %v48_v20, %v52_v19 }
  0x8c   :  { %v34_v12 = vsel %vm33_vm0, %v31_v8, 0.0 }
  0x8d   :  { %v29_v9 = vpop.permute.xlu0 %28 }
  0x8e   :  { %v32_v10 = vmul.f32 %v29_v9, %v18_v7 }
  0x90   :  { %v36_v13 = vsel %vm35_vm1, %v32_v10, 0.0 }
  0x91   :  { %v37_v14 = vadd.f32 %v36_v13, %v34_v12 }
  0x93   :  { %v38_v15 = vrot.slane %v37_v14, 4 }
  0x95   :  { %v39_v17 = vadd.f32 %v38_v15, %v37_v14 }
  0x97   :  { %v40_v18 = vrot.slane %v39_v17, 2 }
  0x99   :  { %v41_v21 = vadd.f32 %v40_v18, %v39_v17 }
  0x9b   :  { %v42_v22 = vrot.slane %v41_v21, 1 }
  0x9d   :  { %v43_v24 = vadd.f32 %v42_v22, %v41_v21 }
  0x9f   :  { %v54_v25 = vadd.f32 %v53_v23, %v43_v24 }
  0xa1   :  { %56 = vst.msk [vmem:[#allocation3] sm:$0x1] %vm55_vm2, %v54_v25 }
  0xa2   :  { %86 = shalt.err (!%p83_p4)
}
  0xa3   :  { %s87_s25 = scalar_lea.hbm %s151_s3, 16 }
  0xa4   :  { %p88_p5 = scmp.ne.s32.totalorder %s151_s3, %s87_s25  ;;  %p91_p6 = scmp.lt.u32.totalorder %s87_s25, %s151_s3 }
  0xa6   :  { %p93_p7 = pnand %p91_p6, %p88_p5 }
  0xa8   :  { %96 = shalt.err (!%p93_p7)
}
  0xa9   :  { %66 = dma.vmem_to_hbm [thread:$0]  %s64_s0, 16, %s151_s3, [#allocation4]  }
  0xaa   :  { %97 = dma.done.wait [#allocation4], 16  }
  0xab   :  { %98 = vsyncadd [#allocation4], 4294967280 }
  0xac   :  { %70 = vsyncpa [#allocation4], 1 }

</bundles_post_ra>
